<compile_context>
chip_gen: v7x
topology: tpu7x:2x2x1
jax: 0.10.0
libtpu: 0.0.40
codegen_flags: <defaults>
</compile_context>

<pallas_src>
import math

import jax
import jax.numpy as jnp
from jax.experimental import pallas as pl
from jax.experimental.pallas import tpu as pltpu


# --------------------------------------------------------------------------- #
# Kernel
# --------------------------------------------------------------------------- #
def flu_kernel(x_ref, wl_ref, bl_ref, wg_ref, bg_ref, out_ref):
    """x_ref: [TB, FE]; wl/wg: [FE, FE]; bl/bg: [1, FE]; out_ref: [TB, FE].

    Two MXU pushes (local block-diagonal path, global field-tiled path), two
    bias adds, one full-lane-width VPU multiply.  No [TB, 2*FE] temp.
    """
    x = x_ref[...]
    y_loc = jnp.dot(x, wl_ref[...], preferred_element_type=jnp.float32) + bl_ref[...]
    y_glo = jnp.dot(x, wg_ref[...], preferred_element_type=jnp.float32) + bg_ref[...]
    out_ref[...] = (y_loc * y_glo).astype(out_ref.dtype)


# --------------------------------------------------------------------------- #
# Weight packing (plain JAX, call ONCE at parameter-init time, not per forward)
# --------------------------------------------------------------------------- #
def pack_flu_weights(params):
    lw = params["local_w"]           # [F, E, E]
    lb = params["local_b"]           # [F, 1, E]
    gw = params["glo_w"]             # [F*E, E]  (nn.Linear weight, pre-transposed)
    gb = params["glo_b"]             # [E]
    F, E, _ = lw.shape
    FE = F * E

    # Block-diagonal local weight: W_loc[f*E+i, g*E+j] = lw[f, i, j] * (f == g).
    eye = jnp.eye(F, dtype=lw.dtype)
    w_loc = jnp.einsum("fg,fij->figj", eye, lw).reshape(FE, FE)
    b_loc = lb.reshape(1, FE)

    # Global weight with the field broadcast baked into the columns:
    # column f*E+e of w_glo is gw[:, e] for every field f.
    w_glo = jnp.tile(gw, (1, F))                 # [FE, FE]
    b_glo = jnp.tile(gb, F)[None, :]             # [1, FE]
    return w_loc, b_loc, w_glo, b_glo


# --------------------------------------------------------------------------- #
# Wrapper
# --------------------------------------------------------------------------- #
def _round_up(n, m):
    return ((n + m - 1) // m) * m


@jax.jit
def flu_forward(x, w_loc, b_loc, w_glo, b_glo):
    """x: [B, F, E] float32; packed weights from pack_flu_weights()."""
    B, F, E = x.shape
    FE = F * E
    # Block-diagonal packing of the local path only makes sense for modest FE.
    assert FE <= 512, "block-diag packing intended for F*E <= 512"

    # Lane-dense activations; pad batch to a multiple of 8 (f32 sublane).
    Bp = _round_up(B, 8)
    x_flat = x.reshape(B, FE)
    if Bp != B:
        x_flat = jnp.pad(x_flat, ((0, Bp - B), (0, 0)))

    # Fixed tiling rule: >= 2 tiles when there is enough work (v7x dual-TC,
    # DMA pipelining), capped at 512 rows per tile for large batches.
    tb = min(512, _round_up(pl.cdiv(Bp, 2), 8))
    grid = (pl.cdiv(Bp, tb),)

    itemsize = jnp.dtype(x.dtype).itemsize
    cost = pl.CostEstimate(
        flops=2 * 2 * Bp * FE * FE + 3 * Bp * FE,        # two matmuls + adds + mult
        transcendentals=0,
        bytes_accessed=itemsize * (Bp * FE               # x_flat in
                                   + 2 * FE * FE         # resident weights
                                   + 2 * FE              # biases
                                   + Bp * FE),           # output
    )

    out_flat = pl.pallas_call(
        flu_kernel,
        grid=grid,
        in_specs=[
            pl.BlockSpec((tb, FE), lambda i: (i, 0)),    # batch-tiled activations
            pl.BlockSpec((FE, FE), lambda i: (0, 0)),    # resident local (block-diag) W
            pl.BlockSpec((1, FE), lambda i: (0, 0)),     # resident local bias
            pl.BlockSpec((FE, FE), lambda i: (0, 0)),    # resident global (tiled) W
            pl.BlockSpec((1, FE), lambda i: (0, 0)),     # resident global bias
        ],
        out_specs=pl.BlockSpec((tb, FE), lambda i: (i, 0)),  # lane-dense output
        out_shape=jax.ShapeDtypeStruct((Bp, FE), x.dtype),
        compiler_params=pltpu.CompilerParams(
            dimension_semantics=("parallel",)),          # shard batch tiles across TCs
        cost_estimate=cost,
    )(x_flat, w_loc, b_loc, w_glo, b_glo)

    return out_flat[:B].reshape(B, F, E)


# --------------------------------------------------------------------------- #
# Deterministic synthetic init + pure-JAX reference
# --------------------------------------------------------------------------- #
def init_params(key, field_length, embed_dim):
    F, E = field_length, embed_dim
    input_dim = F * E
    ks = jax.random.split(key, 4)

    def xavier(k, shape, fan_in, fan_out):
        bound = math.sqrt(6.0 / (fan_in + fan_out))
        return jax.random.uniform(k, shape, jnp.float32, -bound, bound)

    return {
        "local_w": xavier(ks[0], (F, E, E), E, E),
        "local_b": xavier(ks[1], (F, 1, E), 1, E),
        # glo_trans = nn.Linear(F*E, E); weight stored pre-transposed as [F*E, E].
        "glo_w": xavier(ks[2], (input_dim, E), input_dim, E),
        "glo_b": jax.random.uniform(ks[3], (E,), jnp.float32, -0.1, 0.1),
    }


def flu_reference(x, p):
    """Pure-JAX mirror of the PyTorch FLU.forward."""
    B, F, E = x.shape
    x_local = jnp.einsum("bfe,fed->bfd", x, p["local_w"]) + p["local_b"].reshape(1, F, E)
    x_glo = x.reshape(B, F * E) @ p["glo_w"] + p["glo_b"]     # [B, E]
    return x_local * x_glo[:, None, :]


# --------------------------------------------------------------------------- #
if __name__ == "__main__":
    F, E = 4, 32                                  # field_length=4, embed_dim=32 -> FE=128
    key = jax.random.PRNGKey(0)
    k_x, k_x2, k_p = jax.random.split(key, 3)

    params = init_params(k_p, F, E)
    packed = pack_flu_weights(params)             # pack ONCE, outside the hot path

    # Small case (B=2: padded to one 8-row tile).
    x = jax.random.normal(k_x, (2, F, E), jnp.float32)
    out = jax.block_until_ready(flu_forward(x, *packed))
    ref = flu_reference(x, params)
    assert out.shape == (2, F, E)
    assert jnp.allclose(out, ref, atol=1e-4, rtol=1e-4), \
        float(jnp.max(jnp.abs(out - ref)))

    # Multi-tile case (B=300 -> padded to 304, two 152-row tiles, grid=(2,)).
    x2 = jax.random.normal(k_x2, (300, F, E), jnp.float32)
    out2 = jax.block_until_ready(flu_forward(x2, *packed))
    ref2 = flu_reference(x2, params)
    assert out2.shape == (300, F, E)
    assert jnp.allclose(out2, ref2, atol=1e-4, rtol=1e-4), \
        float(jnp.max(jnp.abs(out2 - ref2)))

    print("KERNEL_OK")
</pallas_src>

<mosaic_0001>
module attributes {stable_mosaic.version = 11 : i64} {
  func.func @flu_kernel(%arg0: i32, %arg1: memref<8x128xf32, #tpu.memory_space<vmem>>, %arg2: memref<128x128xf32, #tpu.memory_space<vmem>>, %arg3: memref<1x128xf32, #tpu.memory_space<vmem>>, %arg4: memref<128x128xf32, #tpu.memory_space<vmem>>, %arg5: memref<1x128xf32, #tpu.memory_space<vmem>>, %arg6: memref<8x128xf32, #tpu.memory_space<vmem>>) attributes {dimension_semantics = [#tpu.dimension_semantics<parallel>], iteration_bounds = array<i64: 1>, scalar_prefetch = 0 : i64, scratch_operands = 0 : i64, tpu.core_type = #tpu.core_type<tc>, window_params = [{transform_indices = @transform_0, window_bounds = array<i64: 8, 128>}, {pipeline_mode = #tpu.pipeline_mode<synchronous>, transform_indices = @transform_1, window_bounds = array<i64: 128, 128>}, {pipeline_mode = #tpu.pipeline_mode<synchronous>, transform_indices = @transform_2, window_bounds = array<i64: 1, 128>}, {pipeline_mode = #tpu.pipeline_mode<synchronous>, transform_indices = @transform_3, window_bounds = array<i64: 128, 128>}, {pipeline_mode = #tpu.pipeline_mode<synchronous>, transform_indices = @transform_4, window_bounds = array<i64: 1, 128>}, {transform_indices = @transform_5, window_bounds = array<i64: 8, 128>}]} {
    %c0 = arith.constant 0 : index
    %c0_0 = arith.constant 0 : index
    %0 = vector.load %arg1[%c0, %c0_0] : memref<8x128xf32, #tpu.memory_space<vmem>>, vector<8x128xf32>
    %c0_1 = arith.constant 0 : index
    %c0_2 = arith.constant 0 : index
    %1 = vector.load %arg2[%c0_1, %c0_2] : memref<128x128xf32, #tpu.memory_space<vmem>>, vector<128x128xf32>
    %cst = arith.constant dense<0.000000e+00> : vector<8x128xf32>
    %2 = tpu.matmul %0, %1, %cst {dimension_numbers = #tpu.dot_dimension_numbers<[1], [0], [0], [1], [0, 0, 1, 1], [], []>} : vector<8x128xf32>, vector<128x128xf32>, vector<8x128xf32> -> vector<8x128xf32>
    %c0_3 = arith.constant 0 : index
    %c0_4 = arith.constant 0 : index
    %3 = vector.load %arg3[%c0_3, %c0_4] : memref<1x128xf32, #tpu.memory_space<vmem>>, vector<1x128xf32>
    %4 = vector.broadcast %3 : vector<1x128xf32> to vector<8x128xf32>
    %5 = arith.addf %2, %4 : vector<8x128xf32>
    %c0_5 = arith.constant 0 : index
    %c0_6 = arith.constant 0 : index
    %6 = vector.load %arg4[%c0_5, %c0_6] : memref<128x128xf32, #tpu.memory_space<vmem>>, vector<128x128xf32>
    %cst_7 = arith.constant dense<0.000000e+00> : vector<8x128xf32>
    %7 = tpu.matmul %0, %6, %cst_7 {dimension_numbers = #tpu.dot_dimension_numbers<[1], [0], [0], [1], [0, 0, 1, 1], [], []>} : vector<8x128xf32>, vector<128x128xf32>, vector<8x128xf32> -> vector<8x128xf32>
    %c0_8 = arith.constant 0 : index
    %c0_9 = arith.constant 0 : index
    %8 = vector.load %arg5[%c0_8, %c0_9] : memref<1x128xf32, #tpu.memory_space<vmem>>, vector<1x128xf32>
    %9 = vector.broadcast %8 : vector<1x128xf32> to vector<8x128xf32>
    %10 = arith.addf %7, %9 : vector<8x128xf32>
    %11 = arith.mulf %5, %10 : vector<8x128xf32>
    %c0_10 = arith.constant 0 : index
    %c0_11 = arith.constant 0 : index
    %12 = vector.load %arg6[%c0_10, %c0_11] : memref<8x128xf32, #tpu.memory_space<vmem>>, vector<8x128xf32>
    tpu.vector_store %arg6[%c0_10, %c0_11], %11 {strides = array<i32>} : memref<8x128xf32, #tpu.memory_space<vmem>>, vector<8x128xf32>,
    return
  }
  func.func @transform_0(%arg0: i32) -> (i32, i32) {
    %c0_i32 = arith.constant 0 : i32
    %c0_i32_0 = arith.constant 0 : i32
    return %arg0, %c0_i32 : i32, i32
  }
  func.func @transform_1(%arg0: i32) -> (i32, i32) {
    %c0_i32 = arith.constant 0 : i32
    %c0_i32_0 = arith.constant 0 : i32
    %c0_i32_1 = arith.constant 0 : i32
    return %c0_i32, %c0_i32_0 : i32, i32
  }
  func.func @transform_2(%arg0: i32) -> (i32, i32) {
    %c0_i32 = arith.constant 0 : i32
    %c0_i32_0 = arith.constant 0 : i32
    %c0_i32_1 = arith.constant 0 : i32
    return %c0_i32, %c0_i32_0 : i32, i32
  }
  func.func @transform_3(%arg0: i32) -> (i32, i32) {
    %c0_i32 = arith.constant 0 : i32
    %c0_i32_0 = arith.constant 0 : i32
    %c0_i32_1 = arith.constant 0 : i32
    return %c0_i32, %c0_i32_0 : i32, i32
  }
  func.func @transform_4(%arg0: i32) -> (i32, i32) {
    %c0_i32 = arith.constant 0 : i32
    %c0_i32_0 = arith.constant 0 : i32
    %c0_i32_1 = arith.constant 0 : i32
    return %c0_i32, %c0_i32_0 : i32, i32
  }
  func.func @transform_5(%arg0: i32) -> (i32, i32) {
    %c0_i32 = arith.constant 0 : i32
    %c0_i32_0 = arith.constant 0 : i32
    return %arg0, %c0_i32 : i32, i32
  }
}

</mosaic_0001>

<bundles_post_ra>
// kernel: flu_forward.1
= control target key start
LH: loop header
LB: loop body
LE: loop exit
PB: predicated region body
PF: predicated region fallthrough
CT: control target
= control target key end

     0   :  { %10 = vsyncpa [#allocation3], 0  ;;  %s541_s0 = inlined_call_operand.vmem [shape: f32[8,128], index: 0, kind: input, shape index: {}]   ;;  %s542_s1 = inlined_call_operand.hbm [shape: f32[128,128], index: 1, kind: input, shape index: {}]   ;;  %s543_s2 = inlined_call_operand.vmem [shape: f32[1,128], index: 2, kind: input, shape index: {}]   ;;  %s544_s3 = inlined_call_operand.hbm [shape: f32[128,128], index: 3, kind: input, shape index: {}]   ;;  %s545_s4 = inlined_call_operand.vmem [shape: f32[1,128], index: 4, kind: input, shape index: {}]   ;;  %s546_s5 = inlined_call_operand.vmem [shape: f32[8,128], index: 5, kind: output, shape index: {}]  }
   0x1   :  { %11 = vsyncpa [#allocation5], 0  ;;  %s452_s18 = smov [#allocation2]   ;;  %s404_s22 = scalar_lea.hbm %s542_s1, 2048 }
   0x2   :  { %s19_s19 = sshll.u32 %s452_s18, 4  ;;  %p405_p0 = scmp.ne.s32.totalorder %s542_s1, %s404_s22  ;;  %s20_s19 = int_to_ptr.vmem [resolvable:$true] %s19_s19 }
   0x3   :  { %p408_p1 = scmp.lt.u32.totalorder %s404_s22, %s542_s1 }
   0x5   :  { %p410_p2 = pnand %p408_p1, %p405_p0 }
   0x7   :  { %413 = shalt.err (!%p410_p2)
}
   0x8   :  { %s414_s27 = scalar_lea.vmem %s20_s19, 2048  ;;  %p419_p4 = scmp.lt.s32.totalorder %s20_s19, %s20_s19 }
   0x9   :  { %p415_p3 = scmp.ne.s32.totalorder %s20_s19, %s414_s27  ;;  %p420_p5 = scmp.lt.s32.totalorder %s414_s27, %s414_s27 }
   0xb   :  { %p421_p6 = por %p420_p5, %p419_p4 }
   0xd   :  { %p422_p7 = pnand %p421_p6, %p415_p3 }
   0xf   :  { %425 = shalt.err (!%p422_p7)
}
  0x10   :  { %s453_s28 = smov 128   ;;  %s454_s29 = smov 8  }
  0x11   :  { %25 = dma.hbm_to_vmem [thread:$0]  %s542_s1, 2048, %s20_s19, [#allocation3], %s453_s28, %s453_s28, %s454_s29  }
  0x12   :  { %s455_s7 = smov [#allocation4]   ;;  %s426_s11 = scalar_lea.hbm %s544_s3, 2048 }
  0x13   :  { %s33_s8 = sshll.u32 %s455_s7, 4  ;;  %p427_p8 = scmp.ne.s32.totalorder %s544_s3, %s426_s11  ;;  %s34_s8 = int_to_ptr.vmem [resolvable:$true] %s33_s8 }
  0x14   :  { %p430_p9 = scmp.lt.u32.totalorder %s426_s11, %s544_s3 }
  0x16   :  { %p432_p10 = pnand %p430_p9, %p427_p8 }
  0x18   :  { %435 = shalt.err (!%p432_p10)
}
  0x19   :  { %s436_s16 = scalar_lea.vmem %s34_s8, 2048  ;;  %p441_p12 = scmp.lt.s32.totalorder %s34_s8, %s34_s8 }
  0x1a   :  { %p437_p11 = scmp.ne.s32.totalorder %s34_s8, %s436_s16  ;;  %p442_p13 = scmp.lt.s32.totalorder %s436_s16, %s436_s16 }
  0x1c   :  { %p443_p0 = por %p442_p13, %p441_p12 }
  0x1e   :  { %p444_p1 = pnand %p443_p0, %p437_p11 }
  0x20   :  { %447 = shalt.err (!%p444_p1)
}
  0x21   :  { %39 = dma.hbm_to_vmem [thread:$0]  %s544_s3, 2048, %s34_s8, [#allocation5], %s453_s28, %s453_s28, %s454_s29  }
  0x22   :  { %448 = dma.done.wait [#allocation3], 2048  }
  0x23   :  { %449 = vsyncadd [#allocation3], 4294965248 }
  0x24   :  { %450 = dma.done.wait [#allocation5], 2048  }
  0x25   :  { %451 = vsyncadd [#allocation5], 4294965248  ;;  %v456_v0 = vmov 0.0|0.0   ;;  %vm457_vm0 = vmmov 0   ;;  %v458_v1 = vmov 0.0   ;;  %v49_v2 = vld [vmem:[#allocation2] sm:$0xff] }
  0x26   :  { %349 = vmatprep.subr.bf16.mxu0 %v456_v0  ;;  %373 = vmatprep.subr.bf16.mxu1 %v456_v0  ;;  %v50_v3 = vld [vmem:[#allocation2 + $0x8] sm:$0xff]  ;;  %v142_v4 = vld [vmem:[#allocation4] sm:$0xff]  ;;  %v51_v7 = vld [vmem:[#allocation2 + $0x10] sm:$0xff] }
  0x27   :  { %311 = vmatprep.mubr.msk.f32.mxu0 %vm457_vm0, %v458_v1  ;;  %346 = vmatprep.mubr.msk.f32.mxu1 %vm457_vm0, %v458_v1  ;;  %v350_v5 = vpack.c.bf16 %v50_v3, %v49_v2  ;;  %v143_v6 = vld [vmem:[#allocation4 + $0x8] sm:$0xff]  ;;  %v52_v8 = vld [vmem:[#allocation2 + $0x18] sm:$0xff]  ;;  %v144_v10 = vld [vmem:[#allocation4 + $0x10] sm:$0xff] }
  0x28   :  { %v374_v9 = vpack.c.bf16 %v143_v6, %v142_v4  ;;  %v145_v11 = vld [vmem:[#allocation4 + $0x18] sm:$0xff]  ;;  %v353_v12 = vpack.c.bf16 %v52_v8, %v51_v7  ;;  %v53_v14 = vld [vmem:[#allocation2 + $0x20] sm:$0xff]  ;;  %v54_v15 = vld [vmem:[#allocation2 + $0x28] sm:$0xff] }
  0x29   :  { %351 = vmatpush3.bf16.msra.mxu0 %v350_v5  ;;  %v377_v13 = vpack.c.bf16 %v145_v11, %v144_v10  ;;  %v146_v16 = vld [vmem:[#allocation4 + $0x20] sm:$0xff]  ;;  %v147_v17 = vld [vmem:[#allocation4 + $0x28] sm:$0xff]  ;;  %v356_v18 = vpack.c.bf16 %v54_v15, %v53_v14  ;;  %v55_v20 = vld [vmem:[#allocation2 + $0x30] sm:$0xff] }
  0x2a   :  { %375 = vmatpush3.bf16.msra.mxu1 %v374_v9  ;;  %352 = vmatprep.subr.bf16.mxu0 %v456_v0  ;;  %v380_v19 = vpack.c.bf16 %v147_v17, %v146_v16  ;;  %v56_v21 = vld [vmem:[#allocation2 + $0x38] sm:$0xff]  ;;  %v148_v22 = vld [vmem:[#allocation4 + $0x30] sm:$0xff]  ;;  %v57_v26 = vld [vmem:[#allocation2 + $0x40] sm:$0xff] }
  0x2b   :  { %376 = vmatprep.subr.bf16.mxu1 %v456_v0  ;;  %v149_v23 = vld [vmem:[#allocation4 + $0x38] sm:$0xff]  ;;  %v359_v24 = vpack.c.bf16 %v56_v21, %v55_v20  ;;  %v58_v27 = vld [vmem:[#allocation2 + $0x48] sm:$0xff]  ;;  %v150_v28 = vld [vmem:[#allocation4 + $0x40] sm:$0xff] }
  0x2c   :  { %v383_v25 = vpack.c.bf16 %v149_v23, %v148_v22  ;;  %v151_v29 = vld [vmem:[#allocation4 + $0x48] sm:$0xff]  ;;  %v362_v30 = vpack.c.bf16 %v58_v27, %v57_v26  ;;  %v59_v32 = vld [vmem:[#allocation2 + $0x50] sm:$0xff]  ;;  %v60_v33 = vld [vmem:[#allocation2 + $0x58] sm:$0xff] }
  0x2d   :  { %354 = vmatpush3.bf16.msra.mxu0 %v353_v12  ;;  %v386_v31 = vpack.c.bf16 %v151_v29, %v150_v28  ;;  %v152_v34 = vld [vmem:[#allocation4 + $0x50] sm:$0xff]  ;;  %v153_v35 = vld [vmem:[#allocation4 + $0x58] sm:$0xff]  ;;  %v365_v36 = vpack.c.bf16 %v60_v33, %v59_v32  ;;  %v61_v38 = vld [vmem:[#allocation2 + $0x60] sm:$0xff] }
  0x2e   :  { %378 = vmatpush3.bf16.msra.mxu1 %v377_v13  ;;  %355 = vmatprep.subr.bf16.mxu0 %v456_v0  ;;  %v389_v37 = vpack.c.bf16 %v153_v35, %v152_v34  ;;  %v62_v39 = vld [vmem:[#allocation2 + $0x68] sm:$0xff]  ;;  %v154_v40 = vld [vmem:[#allocation4 + $0x60] sm:$0xff]  ;;  %v63_v44 = vld [vmem:[#allocation2 + $0x70] sm:$0xff] }
  0x2f   :  { %379 = vmatprep.subr.bf16.mxu1 %v456_v0  ;;  %v155_v41 = vld [vmem:[#allocation4 + $0x68] sm:$0xff]  ;;  %v368_v42 = vpack.c.bf16 %v62_v39, %v61_v38  ;;  %v64_v45 = vld [vmem:[#allocation2 + $0x78] sm:$0xff]  ;;  %v156_v46 = vld [vmem:[#allocation4 + $0x70] sm:$0xff] }
  0x30   :  { %v392_v43 = vpack.c.bf16 %v155_v41, %v154_v40  ;;  %v157_v47 = vld [vmem:[#allocation4 + $0x78] sm:$0xff]  ;;  %v371_v48 = vpack.c.bf16 %v64_v45, %v63_v44  ;;  %v48_v50 = vld [vmem:[%s541_s0] sm:$0xff] }
  0x31   :  { %357 = vmatpush3.bf16.msra.mxu0 %v356_v18  ;;  %v395_v49 = vpack.c.bf16 %v157_v47, %v156_v46  ;;  %v243_v51 = vld [vmem:[%s543_s2] ss:$0 sm:$0xff] }
  0x32   :  { %381 = vmatpush3.bf16.msra.mxu1 %v380_v19  ;;  %358 = vmatprep.subr.bf16.mxu0 %v456_v0  ;;  %v244_v52 = vld [vmem:[%s545_s4] ss:$0 sm:$0xff] }
  0x33   :  { %382 = vmatprep.subr.bf16.mxu1 %v456_v0 }
  0x35   :  { %360 = vmatpush3.bf16.msra.mxu0 %v359_v24 }
  0x36   :  { %384 = vmatpush3.bf16.msra.mxu1 %v383_v25  ;;  %361 = vmatprep.subr.bf16.mxu0 %v456_v0 }
  0x37   :  { %385 = vmatprep.subr.bf16.mxu1 %v456_v0 }
  0x39   :  { %363 = vmatpush3.bf16.msra.mxu0 %v362_v30 }
  0x3a   :  { %387 = vmatpush3.bf16.msra.mxu1 %v386_v31  ;;  %364 = vmatprep.subr.bf16.mxu0 %v456_v0 }
  0x3b   :  { %388 = vmatprep.subr.bf16.mxu1 %v456_v0 }
  0x3d   :  { %366 = vmatpush3.bf16.msra.mxu0 %v365_v36 }
  0x3e   :  { %390 = vmatpush3.bf16.msra.mxu1 %v389_v37  ;;  %367 = vmatprep.subr.bf16.mxu0 %v456_v0 }
  0x3f   :  { %391 = vmatprep.subr.bf16.mxu1 %v456_v0 }
  0x41   :  { %369 = vmatpush3.bf16.msra.mxu0 %v368_v42 }
  0x42   :  { %393 = vmatpush3.bf16.msra.mxu1 %v392_v43  ;;  %370 = vmatprep.subr.bf16.mxu0 %v456_v0 }
  0x43   :  { %394 = vmatprep.subr.bf16.mxu1 %v456_v0 }
  0x45   :  { %372 = vmatpush3.bf16.msra.mxu0 %v371_v48 }
  0x46   :  { %396 = vmatpush3.bf16.msra.mxu1 %v395_v49 }
  0x48   :  { %312 = vmatmul.mubr.f32.vlgmr.msra.gmra.mrb[0].mxu0 %v48_v50 }
  0x49   :  { %347 = vmatmul.mubr.f32.vlgmr.msra.gmra.mrb[0].mxu1 %v48_v50 }
 0x11b   :  { %v138_v53 = vpop.f32.mrb[0].mxu0 }
 0x11c   :  { %v139_v54 = vadd.f32 %v243_v51, %v138_v53  ;;  %v231_v55 = vpop.f32.mrb[0].mxu1  ;;  %v313_v56 = vpop.f32.mrb[1].mxu0 }
 0x11d   :  { %v232_v57 = vadd.f32 %v244_v52, %v231_v55  ;;  %v348_v58 = vpop.f32.mrb[1].mxu1 }
 0x11f   :  { %v235_v59 = vmul.f32 %v232_v57, %v139_v54 }
 0x121   :  { %236 = vst [vmem:[%s546_s5] sm:$0xff] %v235_v59 }
 0x122   :  { %241 = vsyncpa [#allocation3], 1 }
 0x123   :  { %242 = vsyncpa [#allocation5], 1 }

</bundles_post_ra>
